<compile_context>
chip_gen: v6e
topology: v6e:2x2x1
jax: 0.10.0
libtpu: 0.0.40
codegen_flags: <defaults>
</compile_context>

<pallas_src>
import functools

import jax
import jax.numpy as jnp
from jax.experimental import pallas as pl
from jax.experimental.pallas import tpu as pltpu


def _round_up(x, m):
    return (x + m - 1) // m * m


def _absdiff_f32(a, b):
    # |a - b| accumulated in f32; keep the subtract+abs in bf16 when inputs
    # are bf16 (v6e/v7x VPU has bf16 lanes; on v5e the compiler upcasts).
    if a.dtype == jnp.bfloat16:
        return jnp.abs(a - b).astype(jnp.float32)
    return jnp.abs(a.astype(jnp.float32) - b.astype(jnp.float32))


def _mase_kernel(s_ref, t_ref, o_ref, out_ref, acc_ref, *,
                 horizon, window_size, batch, tile, blocks_per_core):
    c = pl.program_id(0)               # core-split axis ("parallel")
    i = pl.program_id(1)               # row-streaming axis ("arbitrary")
    blk = c * blocks_per_core + i      # logical (unclamped) row-block index

    @pl.when(i == 0)
    def _init():
        acc_ref[...] = jnp.zeros_like(acc_ref)

    s = s_ref[...]                     # (H, TB): time on sublanes, rows on lanes
    t = t_ref[...]                     # (H, TB)
    o = o_ref[...]                     # (W, TB)

    # numerator: sum_j |s - t| over the horizon (sublane) axis -> (1, TB)
    up = jnp.sum(_absdiff_f32(s, t), axis=0, keepdims=True)

    # denominator: sum of |consecutive diffs| of concat(obv, tgt) along time,
    # computed piecewise (no concatenate, no (B, W+H) temporary).
    down = _absdiff_f32(t[0:1, :], o[window_size - 1:window_size, :])
    if window_size > 1:
        down = down + jnp.sum(_absdiff_f32(o[1:, :], o[:-1, :]),
                              axis=0, keepdims=True)
    if horizon > 1:
        down = down + jnp.sum(_absdiff_f32(t[1:, :], t[:-1, :]),
                              axis=0, keepdims=True)
    denom = jnp.float32(horizon) * down

    # Every block except (at most) the last logical one is fully valid, so the
    # iota/compare/select work only runs on the tail block (v7x VALU headroom).
    is_full = (blk + 1) * tile <= batch

    @pl.when(is_full)
    def _full():
        acc_ref[...] += up / denom

    @pl.when(jnp.logical_not(is_full))
    def _tail():
        # Partial (or fully out-of-range, clamped-duplicate) block: mask lanes
        # whose global row id >= batch.  jnp.where is an elementwise select,
        # so garbage / zero-denominator padding lanes never reach the
        # accumulator and never produce NaN/Inf.
        lane = jax.lax.broadcasted_iota(jnp.int32, (1, tile), 1) + blk * tile
        valid = lane < batch
        safe = jnp.where(valid, denom, jnp.float32(1.0))
        acc_ref[...] += jnp.where(valid, up / safe, jnp.float32(0.0))

    @pl.when(i == pl.num_programs(1) - 1)
    def _finalize():
        # This core's partial sum, broadcast across its (1, 128) output block.
        out_ref[...] = jnp.zeros_like(out_ref) + jnp.sum(acc_ref[...])


def mase_pallas(src, tgt, obv, *, horizon, window_size, m=1,
                max_lane_tile=65536, core_split=2,
                vmem_budget_bytes=26 * 1024 * 1024):
    # `m` is part of the PyTorch module signature but unused by its forward.
    del m
    s = jnp.reshape(src, (-1, horizon))
    t = jnp.reshape(tgt, (-1, horizon))
    o = jnp.reshape(obv, (-1, window_size))
    B = s.shape[0]
    assert t.shape == (B, horizon) and o.shape == (B, window_size)

    # Lane-dense layout: rows on the fast 128-lane axis, tiny time axis on
    # sublanes.  (See TODO(synk) in the header about removing this HBM pass.)
    sT = s.T                           # (H, B)
    tT = t.T                           # (H, B)
    oT = o.T                           # (W, B)

    esize = s.dtype.itemsize
    bytes_per_lane = (2 * horizon + window_size) * esize
    # Largest lane tile whose double-buffered input blocks + f32 accumulator
    # fit the VMEM budget (safe on v5e/v6e/v7x).
    tb_cap = max(128, (vmem_budget_bytes // (2 * bytes_per_lane + 4)) // 128 * 128)
    TB = min(max_lane_tile, tb_cap, _round_up(B, 128))
    TB = max(128, TB // 128 * 128)     # lane tile must be a multiple of 128

    G = pl.cdiv(B, TB)                 # row blocks; the last one may be partial
    C = max(1, core_split)             # "parallel" splits (2 TCs on v7x)
    G2 = pl.cdiv(G, C)                 # row blocks per core

    def in_map(c, i):
        # Clamp so a fully out-of-range block (odd G under the core split)
        # never issues an out-of-bounds DMA; the kernel masks it to zero.
        return (0, jnp.minimum(c * G2 + i, G - 1))

    kernel = functools.partial(
        _mase_kernel, horizon=horizon, window_size=window_size,
        batch=B, tile=TB, blocks_per_core=G2)

    vmem_bytes = 2 * bytes_per_lane * TB + 4 * TB + (8 << 20)

    out = pl.pallas_call(
        kernel,
        out_shape=jax.ShapeDtypeStruct((1, 128 * C), jnp.float32),
        grid=(C, G2),
        in_specs=[
            pl.BlockSpec((horizon, TB), in_map),
            pl.BlockSpec((horizon, TB), in_map),
            pl.BlockSpec((window_size, TB), in_map),
        ],
        out_specs=pl.BlockSpec((1, 128), lambda c, i: (0, c)),
        scratch_shapes=[pltpu.VMEM((1, TB), jnp.float32)],
        compiler_params=pltpu.CompilerParams(
            dimension_semantics=("parallel", "arbitrary"),
            vmem_limit_bytes=int(vmem_bytes)),
        cost_estimate=pl.CostEstimate(
            flops=4 * B * (2 * horizon + window_size),
            transcendentals=0,
            bytes_accessed=B * (2 * horizon + window_size) * esize + 512 * C),
    )(sT, tT, oT)

    partials = out[0, ::128]           # one partial sum per core split
    return jnp.sum(partials) / jnp.float32(B)


def mase_reference(src, tgt, obv, *, horizon, window_size):
    # Pure-JAX reference mirroring the PyTorch forward exactly.
    s = jnp.reshape(src, (-1, horizon)).astype(jnp.float32)
    t = jnp.reshape(tgt, (-1, horizon)).astype(jnp.float32)
    o = jnp.reshape(obv, (-1, window_size)).astype(jnp.float32)
    full = jnp.concatenate([o, t], axis=1)
    up = jnp.abs(s - t)
    down = jnp.sum(jnp.abs(full[:, 1:] - full[:, :-1]), axis=1, keepdims=True)
    tot = up / down
    return jnp.mean(jnp.mean(tot, axis=1))


if __name__ == "__main__":
    horizon = 8
    window_size = 16
    m = 1  # unused by the module's forward

    def run_case(key, src_shape, obv_shape, **kw):
        k1, k2, k3 = jax.random.split(key, 3)
        src = jax.random.normal(k1, src_shape, dtype=jnp.float32)
        tgt = jax.random.normal(k2, src_shape, dtype=jnp.float32)
        obv = jax.random.normal(k3, obv_shape, dtype=jnp.float32)
        out = mase_pallas(src, tgt, obv, horizon=horizon,
                          window_size=window_size, m=m, **kw)
        out = jax.block_until_ready(out)
        ref = mase_reference(src, tgt, obv, horizon=horizon,
                             window_size=window_size)
        assert jnp.allclose(out, ref, rtol=1e-5, atol=1e-5), (out, ref)

    # 1) Small module-spec shapes (batch=2, groups=4): B=8 rows, one partial
    #    block; the second core split is clamped + fully masked.
    run_case(jax.random.PRNGKey(0), (2, 4, horizon), (2, 4, window_size))

    # 2) B=300 with a 128-lane tile: multi-step grid, odd block count across
    #    the core split, partial tail block (masked accumulate path).
    run_case(jax.random.PRNGKey(1), (300, horizon), (300, window_size),
             max_lane_tile=128)

    # 3) B=512 with a 256-lane tile: both core splits do real work and every
    #    block is full (fast, mask-free accumulate path).
    run_case(jax.random.PRNGKey(2), (512, horizon), (512, window_size),
             max_lane_tile=256)

    print("KERNEL_OK")
</pallas_src>

<mosaic_0001>
module attributes {stable_mosaic.version = 11 : i64} {
  func.func @_mase_kernel(%arg0: i32, %arg1: i32, %arg2: memref<8x128xf32, #tpu.memory_space<vmem>>, %arg3: memref<8x128xf32, #tpu.memory_space<vmem>>, %arg4: memref<16x128xf32, #tpu.memory_space<vmem>>, %arg5: memref<1x128xf32, #tpu.memory_space<vmem>>, %arg6: memref<1x128xf32, #tpu.memory_space<vmem>>) attributes {dimension_semantics = [#tpu.dimension_semantics<parallel>, #tpu.dimension_semantics<arbitrary>], iteration_bounds = array<i64: 2, 1>, scalar_prefetch = 0 : i64, scratch_operands = 1 : i64, tpu.core_type = #tpu.core_type<tc>, window_params = [{transform_indices = @transform_0, window_bounds = array<i64: 8, 128>}, {transform_indices = @transform_1, window_bounds = array<i64: 8, 128>}, {transform_indices = @transform_2, window_bounds = array<i64: 16, 128>}, {transform_indices = @transform_3, window_bounds = array<i64: 1, 128>}]} {
    %c1_i32 = arith.constant 1 : i32
    %0 = arith.muli %arg0, %c1_i32 : i32
    %1 = arith.addi %0, %arg1 : i32
    %c0_i32 = arith.constant 0 : i32
    %2 = arith.cmpi eq, %arg1, %c0_i32 : i32
    %3 = arith.extui %2 : i1 to i32
    %c0_i32_0 = arith.constant 0 : i32
    %4 = arith.cmpi ne, %3, %c0_i32_0 : i32
    scf.if %4 {
      %cst_14 = arith.constant 0.000000e+00 : f32
      %43 = vector.broadcast %cst_14 : f32 to vector<1x128xf32>
      %c0_15 = arith.constant 0 : index
      %c0_16 = arith.constant 0 : index
      %44 = vector.load %arg6[%c0_15, %c0_16] : memref<1x128xf32, #tpu.memory_space<vmem>>, vector<1x128xf32>
      tpu.vector_store %arg6[%c0_15, %c0_16], %43 {strides = array<i32>} : memref<1x128xf32, #tpu.memory_space<vmem>>, vector<1x128xf32>,
    } else {
    }
    %c0 = arith.constant 0 : index
    %c0_1 = arith.constant 0 : index
    %5 = vector.load %arg2[%c0, %c0_1] : memref<8x128xf32, #tpu.memory_space<vmem>>, vector<8x128xf32>
    %c0_2 = arith.constant 0 : index
    %c0_3 = arith.constant 0 : index
    %6 = vector.load %arg3[%c0_2, %c0_3] : memref<8x128xf32, #tpu.memory_space<vmem>>, vector<8x128xf32>
    %c0_4 = arith.constant 0 : index
    %c0_5 = arith.constant 0 : index
    %7 = vector.load %arg4[%c0_4, %c0_5] : memref<16x128xf32, #tpu.memory_space<vmem>>, vector<16x128xf32>
    %8 = arith.subf %5, %6 : vector<8x128xf32>
    %9 = math.absf %8 : vector<8x128xf32>
    %cst = arith.constant dense<0.000000e+00> : vector<128xf32>
    %10 = vector.multi_reduction <add>, %9, %cst [0] : vector<8x128xf32> to vector<128xf32>
    %11 = vector.shape_cast %10 : vector<128xf32> to vector<1x128xf32>
    %12 = vector.extract_strided_slice %6 {offsets = [0, 0], sizes = [1, 128], strides = [1, 1]} : vector<8x128xf32> to vector<1x128xf32>
    %13 = vector.extract_strided_slice %7 {offsets = [15, 0], sizes = [1, 128], strides = [1, 1]} : vector<16x128xf32> to vector<1x128xf32>
    %14 = arith.subf %12, %13 : vector<1x128xf32>
    %15 = math.absf %14 : vector<1x128xf32>
    %16 = vector.extract_strided_slice %7 {offsets = [1, 0], sizes = [15, 128], strides = [1, 1]} : vector<16x128xf32> to vector<15x128xf32>
    %17 = vector.extract_strided_slice %7 {offsets = [0, 0], sizes = [15, 128], strides = [1, 1]} : vector<16x128xf32> to vector<15x128xf32>
    %18 = arith.subf %16, %17 : vector<15x128xf32>
    %19 = math.absf %18 : vector<15x128xf32>
    %cst_6 = arith.constant dense<0.000000e+00> : vector<128xf32>
    %20 = vector.multi_reduction <add>, %19, %cst_6 [0] : vector<15x128xf32> to vector<128xf32>
    %21 = vector.shape_cast %20 : vector<128xf32> to vector<1x128xf32>
    %22 = arith.addf %15, %21 : vector<1x128xf32>
    %23 = vector.extract_strided_slice %6 {offsets = [1, 0], sizes = [7, 128], strides = [1, 1]} : vector<8x128xf32> to vector<7x128xf32>
    %24 = vector.extract_strided_slice %6 {offsets = [0, 0], sizes = [7, 128], strides = [1, 1]} : vector<8x128xf32> to vector<7x128xf32>
    %25 = arith.subf %23, %24 : vector<7x128xf32>
    %26 = math.absf %25 : vector<7x128xf32>
    %cst_7 = arith.constant dense<0.000000e+00> : vector<128xf32>
    %27 = vector.multi_reduction <add>, %26, %cst_7 [0] : vector<7x128xf32> to vector<128xf32>
    %28 = vector.shape_cast %27 : vector<128xf32> to vector<1x128xf32>
    %29 = arith.addf %22, %28 : vector<1x128xf32>
    %cst_8 = arith.constant 8.000000e+00 : f32
    %30 = vector.broadcast %cst_8 : f32 to vector<1x128xf32>
    %31 = arith.mulf %30, %29 : vector<1x128xf32>
    %c1_i32_9 = arith.constant 1 : i32
    %32 = arith.addi %1, %c1_i32_9 : i32
    %c128_i32 = arith.constant 128 : i32
    %33 = arith.muli %32, %c128_i32 : i32
    %c8_i32 = arith.constant 8 : i32
    %34 = arith.cmpi sle, %33, %c8_i32 : i32
    %35 = arith.extui %34 : i1 to i32
    %c0_i32_10 = arith.constant 0 : i32
    %36 = arith.cmpi ne, %35, %c0_i32_10 : i32
    scf.if %36 {
      %c0_14 = arith.constant 0 : index
      %c0_15 = arith.constant 0 : index
      %43 = vector.load %arg6[%c0_14, %c0_15] : memref<1x128xf32, #tpu.memory_space<vmem>>, vector<1x128xf32>
      %44 = arith.divf %11, %31 : vector<1x128xf32>
      %45 = arith.addf %43, %44 : vector<1x128xf32>
      %c0_16 = arith.constant 0 : index
      %c0_17 = arith.constant 0 : index
      %46 = vector.load %arg6[%c0_16, %c0_17] : memref<1x128xf32, #tpu.memory_space<vmem>>, vector<1x128xf32>
      tpu.vector_store %arg6[%c0_16, %c0_17], %45 {strides = array<i32>} : memref<1x128xf32, #tpu.memory_space<vmem>>, vector<1x128xf32>,
    } else {
    }
    %true = arith.constant true
    %37 = arith.xori %34, %true : i1
    %38 = arith.extui %37 : i1 to i32
    %c0_i32_11 = arith.constant 0 : i32
    %39 = arith.cmpi ne, %38, %c0_i32_11 : i32
    scf.if %39 {
      %43 = tpu.iota {dimensions = array<i32: 1>} : vector<1x128xi32>
      %c128_i32_14 = arith.constant 128 : i32
      %44 = arith.muli %1, %c128_i32_14 : i32
      %45 = vector.broadcast %44 : i32 to vector<1x128xi32>
      %46 = arith.addi %43, %45 : vector<1x128xi32>
      %c8_i32_15 = arith.constant 8 : i32
      %47 = vector.broadcast %c8_i32_15 : i32 to vector<1x128xi32>
      %48 = arith.cmpi slt, %46, %47 : vector<1x128xi32>
      %cst_16 = arith.constant 1.000000e+00 : f32
      %49 = vector.broadcast %cst_16 : f32 to vector<1x128xf32>
      %50 = arith.select %48, %31, %49 : vector<1x128xi1>, vector<1x128xf32>
      %c0_17 = arith.constant 0 : index
      %c0_18 = arith.constant 0 : index
      %51 = vector.load %arg6[%c0_17, %c0_18] : memref<1x128xf32, #tpu.memory_space<vmem>>, vector<1x128xf32>
      %52 = arith.divf %11, %50 : vector<1x128xf32>
      %cst_19 = arith.constant 0.000000e+00 : f32
      %53 = vector.broadcast %cst_19 : f32 to vector<1x128xf32>
      %54 = arith.select %48, %52, %53 : vector<1x128xi1>, vector<1x128xf32>
      %55 = arith.addf %51, %54 : vector<1x128xf32>
      %c0_20 = arith.constant 0 : index
      %c0_21 = arith.constant 0 : index
      %56 = vector.load %arg6[%c0_20, %c0_21] : memref<1x128xf32, #tpu.memory_space<vmem>>, vector<1x128xf32>
      tpu.vector_store %arg6[%c0_20, %c0_21], %55 {strides = array<i32>} : memref<1x128xf32, #tpu.memory_space<vmem>>, vector<1x128xf32>,
    } else {
    }
    %c0_i32_12 = arith.constant 0 : i32
    %40 = arith.cmpi eq, %arg1, %c0_i32_12 : i32
    %41 = arith.extui %40 : i1 to i32
    %c0_i32_13 = arith.constant 0 : i32
    %42 = arith.cmpi ne, %41, %c0_i32_13 : i32
    scf.if %42 {
      %cst_14 = arith.constant 0.000000e+00 : f32
      %43 = vector.broadcast %cst_14 : f32 to vector<1x128xf32>
      %c0_15 = arith.constant 0 : index
      %c0_16 = arith.constant 0 : index
      %44 = vector.load %arg6[%c0_15, %c0_16] : memref<1x128xf32, #tpu.memory_space<vmem>>, vector<1x128xf32>
      %45 = vector.shape_cast %44 : vector<1x128xf32> to vector<1x1x128xf32>
      %cst_17 = arith.constant dense<0.000000e+00> : vector<1xf32>
      %46 = vector.multi_reduction <add>, %45, %cst_17 [1, 2] : vector<1x1x128xf32> to vector<1xf32>
      %47 = vector.shape_cast %46 : vector<1xf32> to vector<1x1x1xf32>
      %48 = vector.extract %47[0, 0, 0] : f32 from vector<1x1x1xf32>
      %49 = vector.broadcast %48 : f32 to vector<1x128xf32>
      %50 = arith.addf %43, %49 : vector<1x128xf32>
      %c0_18 = arith.constant 0 : index
      %c0_19 = arith.constant 0 : index
      %51 = vector.load %arg5[%c0_18, %c0_19] : memref<1x128xf32, #tpu.memory_space<vmem>>, vector<1x128xf32>
      tpu.vector_store %arg5[%c0_18, %c0_19], %50 {strides = array<i32>} : memref<1x128xf32, #tpu.memory_space<vmem>>, vector<1x128xf32>,
    } else {
    }
    return
  }
  func.func @transform_0(%arg0: i32, %arg1: i32) -> (i32, i32) {
    %c1_i32 = arith.constant 1 : i32
    %0 = arith.muli %arg0, %c1_i32 : i32
    %1 = arith.addi %0, %arg1 : i32
    %c0_i32 = arith.constant 0 : i32
    %2 = arith.minsi %1, %c0_i32 : i32
    %c0_i32_0 = arith.constant 0 : i32
    %c0_i32_1 = arith.constant 0 : i32
    return %c0_i32_0, %2 : i32, i32
  }
  func.func @transform_1(%arg0: i32, %arg1: i32) -> (i32, i32) {
    %c1_i32 = arith.constant 1 : i32
    %0 = arith.muli %arg0, %c1_i32 : i32
    %1 = arith.addi %0, %arg1 : i32
    %c0_i32 = arith.constant 0 : i32
    %2 = arith.minsi %1, %c0_i32 : i32
    %c0_i32_0 = arith.constant 0 : i32
    %c0_i32_1 = arith.constant 0 : i32
    return %c0_i32_0, %2 : i32, i32
  }
  func.func @transform_2(%arg0: i32, %arg1: i32) -> (i32, i32) {
    %c1_i32 = arith.constant 1 : i32
    %0 = arith.muli %arg0, %c1_i32 : i32
    %1 = arith.addi %0, %arg1 : i32
    %c0_i32 = arith.constant 0 : i32
    %2 = arith.minsi %1, %c0_i32 : i32
    %c0_i32_0 = arith.constant 0 : i32
    %c0_i32_1 = arith.constant 0 : i32
    return %c0_i32_0, %2 : i32, i32
  }
  func.func @transform_3(%arg0: i32, %arg1: i32) -> (i32, i32) {
    %c0_i32 = arith.constant 0 : i32
    %c0_i32_0 = arith.constant 0 : i32
    return %c0_i32, %arg0 : i32, i32
  }
}

</mosaic_0001>

<bundles_post_ra>
// kernel: tpu_custom_call.1
= control target key start
LH: loop header
LB: loop body
LE: loop exit
PB: predicated region body
PF: predicated region fallthrough
CT: control target
= control target key end

     0   :  { %8 = vsyncpa [#allocation4], 0  ;;  %s804_s0 = inlined_call_operand.vmem [shape: f32[8,8], index: 0, kind: input, shape index: {}]   ;;  %s805_s1 = inlined_call_operand.vmem [shape: f32[8,8], index: 1, kind: input, shape index: {}]   ;;  %s806_s2 = inlined_call_operand.vmem [shape: f32[16,8], index: 2, kind: input, shape index: {}]   ;;  %s807_s3 = inlined_call_operand.hbm [shape: f32[1,256], index: 3, kind: output, shape index: {}]  }
   0x1   :  { %10 = vsyncpa [#allocation4 + $0x1], 0  ;;  %s674_s12 = smov 0   ;;  %s676_s13 = smov 0  }
   0x2   :  { %s678_s14 = smov 0   ;;  %s680_s15 = smov 0  }
   0x3   :  { %s682_s16 = smov 0   ;;  %s684_s17 = smov 0  }
   0x4 LB: > { %s486_s18 = sadd.s32 4294967295, %s650_s17   ;;  %s487_s19 = sadd.s32 4294967294, %s650_s17   ;;  %s650_s17 = sphi %s684_s17, %s16_s17   ;;  %s646_s16 = sphi %s682_s16, %s814_s16   ;;  %s642_s15 = sphi %s680_s15, %s813_s15   ;;  %s638_s14 = sphi %s678_s14, %s812_s14   ;;  %s634_s13 = sphi %s676_s13, %s811_s13   ;;  %s630_s12 = sphi %s674_s12, %s810_s12  }
   0x5   : > { %s28_s20 = sadd.s32 1, %s646_s16  ;;  %s131_s21 = sadd.s32 1, %s638_s14 }
   0x6   : > { %p30_p0 = scmp.ge.s32.totalorder %s28_s20, 2  ;;  %p141_p1 = scmp.ne.s32.totalorder %s638_s14, %s634_s13 }
   0x7   : > { %p142_p2 = scmp.eq.s32.totalorder %s486_s18, 1  ;;  %p147_p3 = scmp.ne.s32.totalorder %s634_s13, %s630_s12 }
   0x8   : > { %s816_s20 = smov (%p30_p0, %s28_s20), 0  ;;  %p148_p5 = scmp.eq.s32.totalorder %s487_s19, 1 }
   0x9   : > { %p714_p4 = por %p142_p2, %p141_p1  ;;  %s128_s23 = ssub.s32 %s646_s16, %s816_s20 }
   0xa   : > { %p490_p6 = scmp.ge.s32.totalorder %s650_s17, 1  ;;  %p129_p7 = scmp.eq.s32.totalorder %s128_s23, 0 }
   0xb   : > { %p721_p8 = por %p148_p5, %p147_p3  ;;  %p205_p9 = scmp.lt.s32.totalorder %s650_s17, 3 }
   0xc   : > { %s727_s25 = scalar_select %p129_p7, %s638_s14, %s131_s21  }
   0xd   : > { %p206_p10 = pnand %p490_p6, %p205_p9 }
   0xe   : > { %s242_s26 = sand.u32 (!%p206_p10), 1, %s634_s13   ;;  %p245_p11 = scmp.lt.s32.totalorder (!%p206_p10), %s642_s15, 0 }
   0xf   : > { %209 = sbr.rel (%p206_p10) target bundleno = 334 (0x14e), region = 32  ;;  %s510_s27 = sshll.u32 (!%p206_p10), %s642_s15, 7 }
  0x10   : > { %s735_s29 = sadd.s32 (!%p206_p10), 128, %s510_s27  ;;  %s749_s19 = scalar_lea.vmem (!%p206_p10), [#allocation3], %s242_s26 }
  0x11   : > { %p504_p12 = scmp.gt.s32.totalorder (!%p206_p10), %s735_s29, 8 }
  0x14   : > { %v652_v0 = vmov 0.0   ;;  %s246_s28 = scalar_select %p245_p11, %s642_s15, 0  ;;  %vm298_vm0 = vcmask 1040384   ;;  %vm309_vm1 = vcmask 1046528  }
  0x15   : > { %279 = vst [vmem:[#allocation2] sm:$0x1] %v652_v0 }
  0x16   : > { %s818_s28 = smov (!%p245_p11, %s246_s28), 0 }
  0x17   : > { %s494_s30 = sshll.u32 %s818_s28, 3 }
  0x18   : > { %s250_s6 = scalar_lea.vmem %s804_s0, %s494_s30  ;;  %s260_s9 = scalar_lea.vmem %s805_s1, %s494_s30 }
  0x19   : > { %s270_s18 = scalar_lea.vmem %s806_s2, %s494_s30  ;;  %v280_v1 = vld [vmem:[%s250_s6] sm:$0xff] }
  0x1a   : > { %v281_v2 = vld [vmem:[%s260_s9] sm:$0xff]  ;;  %v283_v4 = vld [vmem:[%s270_s18 + $0x8] sm:$0xff] }
  0x1b   : > { %v282_v3 = vld [vmem:[%s270_s18] sm:$0xff]  ;;  %v284_v5 = vsub.f32 %v280_v1, %v281_v2  ;;  %v325_v6 = vrot.slane %v281_v2, 7  ;;  %v293_v7 = vrot.slane %v283_v4, 7 }
  0x1c   : > { %v299_v8 = vrot.slane %v282_v3, 7 }
  0x1d   : > { %v285_v9 = vand.u32 2147483647, %v284_v5  ;;  %v327_v10 = vsub.f32 %v281_v2, %v325_v6  ;;  %v295_v36 = vsub.f32 %v281_v2, %v293_v7 }
  0x1e   : > { %v300_v11 = vsel %vm298_vm0, %v299_v8, %v293_v7  ;;  %v303_v12 = vsub.f32 %v282_v3, %v299_v8 }
  0x1f   : > { %v286_v13 = vrot.slane %v285_v9, 4  ;;  %v304_v14 = vsub.f32 %v283_v4, %v300_v11  ;;  %v328_v15 = vand.u32 2147483647, %v327_v10  ;;  %v296_v40 = vand.u32 2147483647, %v295_v36 }
  0x20   : > { %v305_v16 = vand.u32 2147483647, %v303_v12 }
  0x21   : > { %v287_v17 = vadd.f32 %v286_v13, %v285_v9  ;;  %v306_v18 = vand.u32 2147483647, %v304_v14  ;;  %v330_v19 = vrot.slane %v328_v15, 1 }
  0x22   : > { %v310_v20 = vrot.slane %v305_v16, 1 }
  0x23   : > { %v288_v21 = vrot.slane %v287_v17, 2  ;;  %v311_v22 = vrot.slane %v306_v18, 1  ;;  %v332_v23 = vsel %vm309_vm1, %v330_v19, 0.0 }
  0x24   : > { %v333_v24 = vrot.slane %v332_v23, 4 }
  0x25   : > { %v289_v25 = vadd.f32 %v288_v21, %v287_v17  ;;  %v312_v26 = vsel %vm309_vm1, %v310_v20, %v311_v22  ;;  %v315_v27 = vsel %vm309_vm1, %v311_v22, 0.0 }
  0x26   : > { %v316_v28 = vadd.f32 %v315_v27, %v312_v26  ;;  %v334_v29 = vadd.f32 %v333_v24, %v332_v23 }
  0x27   : > { %v290_v30 = vrot.slane %v289_v25, 1 }
  0x28   : > { %v317_v31 = vrot.slane %v316_v28, 4  ;;  %v335_v32 = vrot.slane %v334_v29, 2 }
  0x29   : > { %v291_v33 = vadd.f32 %v290_v30, %v289_v25 }
  0x2a   : > { %v318_v34 = vadd.f32 %v317_v31, %v316_v28  ;;  %v336_v35 = vadd.f32 %v335_v32, %v334_v29 }
  0x2c   : > { %v319_v37 = vrot.slane %v318_v34, 2  ;;  %v337_v39 = vrot.slane %v336_v35, 1 }
  0x2e   : > { %v320_v38 = vadd.f32 %v319_v37, %v318_v34  ;;  %v338_v43 = vadd.f32 %v337_v39, %v336_v35 }
  0x30   : > { %v321_v41 = vrot.slane %v320_v38, 1 }
  0x32   : > { %v322_v42 = vadd.f32 %v321_v41, %v320_v38 }
  0x34   : > { %v323_v44 = vadd.f32 %v322_v42, %v296_v40  ;;  %346 = sbr.rel (%p504_p12) target bundleno = 77 (0x4d), region = 40 }
  0x36   : > { %v339_v45 = vadd.f32 %v338_v43, %v323_v44 }
  0x38   : > { %v340_v46 = vmul.f32 8.0, %v339_v45 }
  0x39   : > { %v347_v48 = vld [vmem:[#allocation2] sm:$0x1] }
  0x3a   : > { %570 = vrcp.f32 %v340_v46 }
  0x47   : > { %v571_v47 = vpop.eup %570 }
  0x48   : > { %v349_v49 = vmul.f32 %v571_v47, %v291_v33 }
  0x4a   : > { %v350_v50 = vadd.f32 %v349_v49, %v347_v48 }
  0x4c   : > { %351 = vst [vmem:[#allocation2] sm:$0x1] %v350_v50 }
  0x4d PF: > { %p505_p13 = scmp.le.s32.totalorder %s735_s29, 8 }
  0x4f   : > { %355 = sbr.rel (%p505_p13) target bundleno = 112 (0x70), region = 44 }
  0x54   : > { %v356_v51 = vlaneseq  ;;  %v359_v52 = vstv %s510_s27  ;;  %v363_v57 = vld [vmem:[#allocation2] sm:$0x1] }
  0x56   : > { %v357_v53 = vand.u32 127, %v356_v51 }
  0x58   : > { %v360_v54 = vadd.s32 %v359_v52, %v357_v53 }
  0x5a   : > { %vm361_vm2 = vcmp.lt.s32.totalorder %v360_v54, 8 }
  0x5b   : > { %v362_v55 = vsel %vm361_vm2, %v340_v46, 1.0 }
  0x5c   : > { %572 = vrcp.f32 %v362_v55 }
  0x69   : > { %v573_v56 = vpop.eup %572 }
  0x6a   : > { %v365_v58 = vmul.f32 %v573_v56, %v291_v33 }
  0x6c   : > { %v366_v59 = vsel %vm361_vm2, %v365_v58, 0.0 }
  0x6d   : > { %v367_v60 = vadd.f32 %v366_v59, %v363_v57 }
  0x6f   : > { %368 = vst [vmem:[#allocation2] sm:$0x1] %v367_v60 }
  0x70 PF: > { %s507_s21 = sshll.u32 %s642_s15, 4  ;;  %s399_s23 = sshll.u32 %s749_s19, 4  ;;  %s400_s23 = int_to_ptr.vmem [resolvable:$true] %s399_s23 }
  0x71   : > { %s761_s29 = scalar_lea.hbm %s807_s3, %s507_s21  ;;  %s387_s4 = scalar_lea.sflag [#allocation4], %s242_s26 }
  0x72   : > { %s574_s5 = scalar_lea.vmem %s400_s23, 16  ;;  %s653_s6 = smov [#allocation3]  }
  0x73   : > { %p575_p0 = scmp.ne.s32.totalorder %s400_s23, %s574_s5  ;;  %s578_s7 = sshll.u32 %s653_s6, 4  ;;  %s579_s7 = int_to_ptr.vmem [resolvable:$false] %s578_s7 }
  0x74   : > { %s580_s15 = scalar_lea.vmem %s579_s7, 32  ;;  %p581_p3 = scmp.lt.s32.totalorder %s400_s23, %s579_s7 }
  0x75   : > { %p576_p1 = pnand %p575_p0, %p714_p4  ;;  %p582_p5 = scmp.lt.s32.totalorder %s580_s15, %s574_s5 }
  0x76   : > { %v372_v61 = vld [vmem:[#allocation2] sm:$0x1] }
  0x77   : > { %v373_v62 = vsel %vm298_vm0, %v372_v61, 0.0  ;;  %p577_p2 = pneg %p576_p1  ;;  %p583_p6 = por %p582_p5, %p581_p3 }
  0x78   : > { %374 = vadd.xlane.f32.xlu0 %v373_v62 }
  0x79   : > { %p584_p7 = pnand %p583_p6, %p577_p2 }
 0x101   : > { %v375_v63 = vpop.xlane.xlu0 %374 }
 0x102   : > { %v376_v0 = vrot.slane %v375_v63, 4 }
 0x104   : > { %v377_v1 = vadd.f32 %v376_v0, %v375_v63 }
 0x106   : > { %v378_v2 = vrot.slane %v377_v1, 2 }
 0x108   : > { %v379_v3 = vadd.f32 %v378_v2, %v377_v1 }
 0x10a   : > { %v380_v4 = vrot.slane %v379_v3, 1 }
 0x10c   : > { %v381_v5 = vadd.f32 %v380_v4, %v379_v3 }
 0x10e   : > { %512 = vpush %v381_v5 }
 0x13f   : > { %s513_s30 = spop %512 }
 0x140   : > { %v383_v6 = vstv %s513_s30 }
 0x141   : > { %385 = vst [vmem:[%s749_s19] sm:$0x1] %v383_v6 }
 0x142   : > { %587 = shalt.err (!%p584_p7)
}
 0x143   : > { %s588_s8 = scalar_lea.hbm %s761_s29, 16  ;;  %s592_s10 = scalar_lea.hbm %s807_s3, 32 }
 0x144   : > { %p589_p9 = scmp.ne.s32.totalorder %s761_s29, %s588_s8  ;;  %p593_p12 = scmp.lt.s32.totalorder %s761_s29, %s807_s3 }
 0x145   : > { %p594_p13 = scmp.lt.s32.totalorder %s592_s10, %s588_s8 }
 0x146   : > { %p590_p10 = pnand %p589_p9, %p714_p4 }
 0x147   : > { %p595_p0 = por %p594_p13, %p593_p12 }
 0x148   : > { %p591_p11 = pneg %p590_p10 }
 0x14a   : > { %p596_p1 = pnand %p595_p0, %p591_p11 }
 0x14c   : > { %599 = shalt.err (!%p596_p1)
}
 0x14d   : > { %514 = dma.vmem_to_hbm [thread:$0]  (%p714_p4), %s400_s23, 16, %s761_s29, %s387_s4  }
 0x14e PF: > { %p520_p2 = scmp.ge.s32.totalorder %s650_s17, 2  ;;  %s411_s19 = sand.u32 1, %s630_s12  }
 0x14f   : > { %s412_s21 = scalar_lea.sflag [#allocation4], %s411_s19 }
 0x150   : > { %p517_p3 = pnand %p520_p2, %p721_p8 }
 0x152   : > { %p518_p5 = pneg %p517_p3 }
 0x154   : > { %625 = dma.done.wait (%p518_p5), %s412_s21, 16  }
 0x155   : > { %627 = vsyncadd (%p518_p5), %s412_s21, 4294967280  ;;  %s16_s17 = sadd.s32 1, %s650_s17   ;;  %s810_s12 = smov %s634_s13 }
 0x156   : > { %p13_p6 = scmp.ge.s32.totalorder %s16_s17, 4   ;;  %s811_s13 = smov %s638_s14 }
 0x157   : > { %s812_s14 = smov %s727_s25  ;;  %s813_s15 = smov %s646_s16 }
 0x158   : > { %s814_s16 = smov %s816_s20  ;;  %15 = sbr.rel (!%p13_p6) target bundleno = 4 (0x4), region = 89 }
 0x15d   :  { %416 = vsyncpa [#allocation4], 1 }
 0x15e   :  { %418 = vsyncpa [#allocation4 + $0x1], 1 }

</bundles_post_ra>
